<compile_context>
chip_gen: v7x
topology: tpu7x:2x2x1
jax: 0.10.0
libtpu: 0.0.40
codegen_flags: <defaults>
</compile_context>

<pallas_src>
import math
import functools

import jax
import jax.numpy as jnp
from jax.experimental import pallas as pl
from jax.experimental.pallas import tpu as pltpu


def hca_kernel(ref0_ref, tar_ref, cap_ref,
               w_fc_ref, wq_ref, wkt_ref, wktar_ref, wv_ref,
               biases_ref, out_ref, *, inv_dim):
    f32 = jnp.float32
    bf16 = jnp.bfloat16

    B, hw, hi = tar_ref.shape
    lc = cap_ref.shape[1]
    d = w_fc_ref.shape[1]

    # Stacked biases (f32): rows = [b_fc, b_q, b_ktext, b_ktar, b_v].
    b_fc = biases_ref[0:1, :]
    b_q = biases_ref[1:2, :]
    b_kt = biases_ref[2:3, :]
    b_ktar = biases_ref[3:4, :]
    b_v = biases_ref[4:5, :]

    w_fc = w_fc_ref[...]                                        # bf16 (hi, d)

    # fc1 + ReLU.  Only row 0 of the reference stream is consumed downstream
    # (psudo_T[:, 0, :]), so the ref path is a single row per batch element.
    ref0 = ref0_ref[...].reshape(B, hi)                         # bf16
    ref_e0 = jnp.maximum(
        jnp.dot(ref0, w_fc, preferred_element_type=f32) + b_fc, 0.0)      # (B, d)

    tar_flat = tar_ref[...].reshape(B * hw, hi)                 # bf16
    tar_e = jnp.maximum(
        jnp.dot(tar_flat, w_fc, preferred_element_type=f32) + b_fc, 0.0)  # (B*hw, d)

    # Linear projections: bf16 operands, f32 accumulation on the MXU.
    q0 = jnp.dot(ref_e0.astype(bf16), wq_ref[...],
                 preferred_element_type=f32) + b_q                        # (B, d)
    cap_flat = cap_ref[...].reshape(B * lc, d)
    kt = jnp.dot(cap_flat, wkt_ref[...],
                 preferred_element_type=f32) + b_kt                       # (B*lc, d)
    tar_e16 = tar_e.astype(bf16)
    ktar = jnp.dot(tar_e16, wktar_ref[...],
                   preferred_element_type=f32) + b_ktar                   # (B*hw, d)
    v = jnp.dot(tar_e16, wv_ref[...],
                preferred_element_type=f32) + b_v                         # (B*hw, d)

    q3 = q0.reshape(B, 1, d)
    kt3 = kt.reshape(B, lc, d)
    ktar3 = ktar.reshape(B, hw, d)
    v3 = v.reshape(B, hw, d)

    # Hinge attention, row 0 only, re-associated as ((q Kt^T) Kt) Ktar^T / d.
    # Both 1/sqrt(d) factors are folded into a single 1/d applied to attA
    # (the smallest tensor).  Every "transposed" product contracts the last
    # dim of both operands (dot_general), so no in-kernel XLU transposes.
    attA = jnp.einsum('bqd,bkd->bqk', q3, kt3,
                      preferred_element_type=f32) * inv_dim               # (B,1,lc)
    t = jnp.einsum('bqk,bkd->bqd', attA, kt3,
                   preferred_element_type=f32)                            # (B,1,d)
    s = jnp.einsum('bqd,bkd->bqk', t, ktar3,
                   preferred_element_type=f32)                            # (B,1,hw)

    # Row-wise softmax over the (single) query row.
    s_max = jnp.max(s, axis=-1, keepdims=True)
    e = jnp.exp(s - s_max)
    p = e * pl.reciprocal(jnp.sum(e, axis=-1, keepdims=True), approx=True)
    # TODO(synk): dropout1 is eval-mode identity; intentionally omitted.

    out_ref[...] = jnp.einsum('bqk,bkd->bqd', p, v3,
                              preferred_element_type=f32)                 # (B,1,d)


def hinge_cross_attention(reference_nchw, caption, target_nchw, params,
                          embed_dim):
    bs, hi, h, w = reference_nchw.shape
    hw = h * w
    lc = caption.shape[1]
    d = embed_dim
    bf16 = jnp.bfloat16

    # torch .view(bs, h*w, hi) on a contiguous NCHW tensor == raw row-major
    # reshape (NOT a transpose).  Reproduce it exactly.
    ref = reference_nchw.reshape(bs, hw, hi)
    tar = target_nchw.reshape(bs, hw, hi)

    # Only psudo_T[:, 0, :] is returned, so only ref row 0 ever matters.
    ref0 = ref[:, 0:1, :]                                      # (bs, 1, hi)

    # Pack batches per grid step so the MXU M dimension (B_TILE*hw) is filled.
    b_tile = max(1, min(bs, (256 + hw - 1) // hw))
    bs_pad = int(pl.cdiv(bs, b_tile)) * b_tile
    if bs_pad != bs:
        pad = [(0, bs_pad - bs), (0, 0), (0, 0)]
        ref0 = jnp.pad(ref0, pad)
        tar = jnp.pad(tar, pad)
        caption = jnp.pad(caption, pad)
    grid = bs_pad // b_tile

    # bf16 operands (halves HBM->VMEM traffic), f32 accumulation in-kernel.
    ref0_16 = ref0.astype(bf16)
    tar_16 = tar.astype(bf16)
    cap_16 = caption.astype(bf16)
    w_fc = params["w_fc"].astype(bf16)
    wq = params["wq"].astype(bf16)
    wkt = params["wkt"].astype(bf16)
    wktar = params["wktar"].astype(bf16)
    wv = params["wv"].astype(bf16)
    # Five (1, d) biases collapsed into a single (5, d) f32 stream.
    biases = jnp.concatenate(
        [params["b_fc"], params["bq"], params["bkt"],
         params["bktar"], params["bv"]], axis=0).astype(jnp.float32)

    kernel = functools.partial(hca_kernel, inv_dim=1.0 / float(d))

    full = lambda shape: pl.BlockSpec(shape, lambda i: (0,) * len(shape))

    # Rough VMEM budget (double-buffered batch streams + resident weights),
    # capped well under v7x's 64 MiB.
    blk_bytes = 2 * (b_tile * hi * 2 + b_tile * hw * hi * 2
                     + b_tile * lc * d * 2 + b_tile * d * 4)
    w_bytes = (hi * d + 4 * d * d) * 2 + 5 * d * 4
    vmem_bytes = int(min(max(4 * (blk_bytes + w_bytes) + (4 << 20), 8 << 20),
                         48 << 20))

    out = pl.pallas_call(
        kernel,
        out_shape=jax.ShapeDtypeStruct((bs_pad, 1, d), jnp.float32),
        grid_spec=pltpu.PrefetchScalarGridSpec(
            num_scalar_prefetch=0,
            grid=(grid,),
            in_specs=[
                pl.BlockSpec((b_tile, 1, hi), lambda i: (i, 0, 0)),   # ref row 0
                pl.BlockSpec((b_tile, hw, hi), lambda i: (i, 0, 0)),  # target
                pl.BlockSpec((b_tile, lc, d), lambda i: (i, 0, 0)),   # caption
                full((hi, d)),   # w_fc
                full((d, d)),    # wq
                full((d, d)),    # wkt
                full((d, d)),    # wktar
                full((d, d)),    # wv
                full((5, d)),    # stacked biases
            ],
            out_specs=pl.BlockSpec((b_tile, 1, d), lambda i: (i, 0, 0)),
        ),
        compiler_params=pltpu.CompilerParams(
            dimension_semantics=("parallel",),
            vmem_limit_bytes=vmem_bytes),
    )(ref0_16, tar_16, cap_16, w_fc, wq, wkt, wktar, wv, biases)

    # forward returns psudo_T[:, 0, :]
    return out[:bs, 0, :]


def reference_forward(reference_nchw, caption, target_nchw, params, embed_dim):
    # Pure-JAX f32 reference that mirrors the torch module structure exactly
    # (full hw attention, two separate 1/sqrt(d) scalings, attA @ attB).
    bs, hi, h, w = reference_nchw.shape
    ref = reference_nchw.reshape(bs, h * w, hi)
    tar = target_nchw.reshape(bs, h * w, hi)
    relu = lambda x: jnp.maximum(x, 0.0)
    ref_e = relu(ref @ params["w_fc"] + params["b_fc"])
    tar_e = relu(tar @ params["w_fc"] + params["b_fc"])
    q = ref_e @ params["wq"] + params["bq"]
    kt = caption @ params["wkt"] + params["bkt"]
    ktar = tar_e @ params["wktar"] + params["bktar"]
    v = tar_e @ params["wv"] + params["bv"]
    inv = 1.0 / math.sqrt(embed_dim)
    attA = jnp.einsum("bqd,bkd->bqk", q, kt) * inv
    attB = jnp.einsum("bkd,bqd->bkq", kt, ktar) * inv
    s = jnp.einsum("bqk,bkp->bqp", attA, attB)
    p = jax.nn.softmax(s, axis=-1)
    psudo = jnp.einsum("bqp,bpd->bqd", p, v)
    return psudo[:, 0, :]


if __name__ == "__main__":
    # Small shapes consistent with the module structure:
    #   torch: fc1 Linear(2560, 640), embed_dim = 640, NCHW refs/targets.
    #   here : FC_IN = 256 stands in for 2560, EMBED_DIM = 128 for 640.
    BS, FC_IN, H, W = 2, 256, 4, 4
    EMBED_DIM = 128
    LEN_C = 8

    key = jax.random.PRNGKey(0)
    keys = jax.random.split(key, 16)

    def lin(kw, kb, n_in, n_out):
        bound = 1.0 / math.sqrt(n_in)
        w = jax.random.uniform(kw, (n_in, n_out), jnp.float32, -bound, bound)
        b = jax.random.uniform(kb, (1, n_out), jnp.float32, -bound, bound)
        return w, b

    w_fc, b_fc = lin(keys[0], keys[1], FC_IN, EMBED_DIM)          # fc1
    wq, bq = lin(keys[2], keys[3], EMBED_DIM, EMBED_DIM)          # query_ref1
    wkt, bkt = lin(keys[4], keys[5], EMBED_DIM, EMBED_DIM)        # key_text1
    wktar, bktar = lin(keys[6], keys[7], EMBED_DIM, EMBED_DIM)    # key_tar1
    wv, bv = lin(keys[8], keys[9], EMBED_DIM, EMBED_DIM)          # value1

    params = dict(w_fc=w_fc, b_fc=b_fc, wq=wq, bq=bq, wkt=wkt, bkt=bkt,
                  wktar=wktar, bktar=bktar, wv=wv, bv=bv)

    reference_embeds = jax.random.normal(keys[10], (BS, FC_IN, H, W), jnp.float32)
    target_embeds = jax.random.normal(keys[11], (BS, FC_IN, H, W), jnp.float32)
    caption_embeds = jax.random.normal(keys[12], (BS, LEN_C, EMBED_DIM), jnp.float32)

    out = hinge_cross_attention(reference_embeds, caption_embeds,
                                target_embeds, params, EMBED_DIM)
    out = jax.block_until_ready(out)

    ref_out = reference_forward(reference_embeds, caption_embeds,
                                target_embeds, params, EMBED_DIM)
    assert out.shape == (BS, EMBED_DIM), out.shape
    max_err = float(jnp.max(jnp.abs(out - ref_out)))
    # bf16 matmul operands (f32 accumulation) -> tolerance relaxed vs. pure-f32.
    assert jnp.allclose(out, ref_out, atol=2e-2, rtol=2e-2), max_err

    print("KERNEL_OK")
</pallas_src>

<mosaic_0001>
module attributes {stable_mosaic.version = 11 : i64} {
  func.func @hca_kernel(%arg0: i32, %arg1: memref<2x1x256xbf16, #tpu.memory_space<vmem>>, %arg2: memref<2x16x256xbf16, #tpu.memory_space<vmem>>, %arg3: memref<2x8x128xbf16, #tpu.memory_space<vmem>>, %arg4: memref<256x128xbf16, #tpu.memory_space<vmem>>, %arg5: memref<128x128xbf16, #tpu.memory_space<vmem>>, %arg6: memref<128x128xbf16, #tpu.memory_space<vmem>>, %arg7: memref<128x128xbf16, #tpu.memory_space<vmem>>, %arg8: memref<128x128xbf16, #tpu.memory_space<vmem>>, %arg9: memref<5x128xf32, #tpu.memory_space<vmem>>, %arg10: memref<2x1x128xf32, #tpu.memory_space<vmem>>) attributes {dimension_semantics = [#tpu.dimension_semantics<parallel>], iteration_bounds = array<i64: 1>, scalar_prefetch = 0 : i64, scratch_operands = 0 : i64, tpu.core_type = #tpu.core_type<tc>, window_params = [{transform_indices = @transform_0, window_bounds = array<i64: 2, 1, 256>}, {transform_indices = @transform_1, window_bounds = array<i64: 2, 16, 256>}, {transform_indices = @transform_2, window_bounds = array<i64: 2, 8, 128>}, {pipeline_mode = #tpu.pipeline_mode<synchronous>, transform_indices = @transform_3, window_bounds = array<i64: 256, 128>}, {pipeline_mode = #tpu.pipeline_mode<synchronous>, transform_indices = @transform_4, window_bounds = array<i64: 128, 128>}, {pipeline_mode = #tpu.pipeline_mode<synchronous>, transform_indices = @transform_5, window_bounds = array<i64: 128, 128>}, {pipeline_mode = #tpu.pipeline_mode<synchronous>, transform_indices = @transform_6, window_bounds = array<i64: 128, 128>}, {pipeline_mode = #tpu.pipeline_mode<synchronous>, transform_indices = @transform_7, window_bounds = array<i64: 128, 128>}, {pipeline_mode = #tpu.pipeline_mode<synchronous>, transform_indices = @transform_8, window_bounds = array<i64: 5, 128>}, {transform_indices = @transform_9, window_bounds = array<i64: 2, 1, 128>}]} {
    %c0 = arith.constant 0 : index
    %c0_0 = arith.constant 0 : index
    %0 = vector.load %arg9[%c0, %c0_0] : memref<5x128xf32, #tpu.memory_space<vmem>>, vector<1x128xf32>
    %c1 = arith.constant 1 : index
    %c0_1 = arith.constant 0 : index
    %1 = vector.load %arg9[%c1, %c0_1] : memref<5x128xf32, #tpu.memory_space<vmem>>, vector<1x128xf32>
    %c2 = arith.constant 2 : index
    %c0_2 = arith.constant 0 : index
    %2 = vector.load %arg9[%c2, %c0_2] : memref<5x128xf32, #tpu.memory_space<vmem>>, vector<1x128xf32>
    %c3 = arith.constant 3 : index
    %c0_3 = arith.constant 0 : index
    %3 = vector.load %arg9[%c3, %c0_3] : memref<5x128xf32, #tpu.memory_space<vmem>>, vector<1x128xf32>
    %c4 = arith.constant 4 : index
    %c0_4 = arith.constant 0 : index
    %4 = vector.load %arg9[%c4, %c0_4] : memref<5x128xf32, #tpu.memory_space<vmem>>, vector<1x128xf32>
    %c0_5 = arith.constant 0 : index
    %c0_6 = arith.constant 0 : index
    %5 = vector.load %arg4[%c0_5, %c0_6] : memref<256x128xbf16, #tpu.memory_space<vmem>>, vector<256x128xbf16>
    %c0_7 = arith.constant 0 : index
    %c0_8 = arith.constant 0 : index
    %c0_9 = arith.constant 0 : index
    %6 = vector.load %arg1[%c0_7, %c0_8, %c0_9] : memref<2x1x256xbf16, #tpu.memory_space<vmem>>, vector<2x1x256xbf16>
    %7 = vector.shape_cast %6 : vector<2x1x256xbf16> to vector<2x256xbf16>
    %cst = arith.constant dense<0.000000e+00> : vector<2x128xf32>
    %8 = tpu.matmul %7, %5, %cst {dimension_numbers = #tpu.dot_dimension_numbers<[1], [0], [0], [1], [0, 0, 1, 1], [], []>} : vector<2x256xbf16>, vector<256x128xbf16>, vector<2x128xf32> -> vector<2x128xf32>
    %9 = vector.broadcast %0 : vector<1x128xf32> to vector<2x128xf32>
    %10 = arith.addf %8, %9 : vector<2x128xf32>
    %cst_10 = arith.constant 0.000000e+00 : f32
    %11 = vector.broadcast %cst_10 : f32 to vector<2x128xf32>
    %12 = arith.maximumf %10, %11 : vector<2x128xf32>
    %c0_11 = arith.constant 0 : index
    %c0_12 = arith.constant 0 : index
    %c0_13 = arith.constant 0 : index
    %13 = vector.load %arg2[%c0_11, %c0_12, %c0_13] : memref<2x16x256xbf16, #tpu.memory_space<vmem>>, vector<2x16x256xbf16>
    %14 = vector.shape_cast %13 : vector<2x16x256xbf16> to vector<32x256xbf16>
    %cst_14 = arith.constant dense<0.000000e+00> : vector<32x128xf32>
    %15 = tpu.matmul %14, %5, %cst_14 {dimension_numbers = #tpu.dot_dimension_numbers<[1], [0], [0], [1], [0, 0, 1, 1], [], []>} : vector<32x256xbf16>, vector<256x128xbf16>, vector<32x128xf32> -> vector<32x128xf32>
    %16 = vector.broadcast %0 : vector<1x128xf32> to vector<32x128xf32>
    %17 = arith.addf %15, %16 : vector<32x128xf32>
    %cst_15 = arith.constant 0.000000e+00 : f32
    %18 = vector.broadcast %cst_15 : f32 to vector<32x128xf32>
    %19 = arith.maximumf %17, %18 : vector<32x128xf32>
    %20 = arith.truncf %12 : vector<2x128xf32> to vector<2x128xbf16>
    %c0_16 = arith.constant 0 : index
    %c0_17 = arith.constant 0 : index
    %21 = vector.load %arg5[%c0_16, %c0_17] : memref<128x128xbf16, #tpu.memory_space<vmem>>, vector<128x128xbf16>
    %cst_18 = arith.constant dense<0.000000e+00> : vector<2x128xf32>
    %22 = tpu.matmul %20, %21, %cst_18 {dimension_numbers = #tpu.dot_dimension_numbers<[1], [0], [0], [1], [0, 0, 1, 1], [], []>} : vector<2x128xbf16>, vector<128x128xbf16>, vector<2x128xf32> -> vector<2x128xf32>
    %23 = vector.broadcast %1 : vector<1x128xf32> to vector<2x128xf32>
    %24 = arith.addf %22, %23 : vector<2x128xf32>
    %c0_19 = arith.constant 0 : index
    %c0_20 = arith.constant 0 : index
    %c0_21 = arith.constant 0 : index
    %25 = vector.load %arg3[%c0_19, %c0_20, %c0_21] : memref<2x8x128xbf16, #tpu.memory_space<vmem>>, vector<2x8x128xbf16>
    %26 = vector.shape_cast %25 : vector<2x8x128xbf16> to vector<16x128xbf16>
    %c0_22 = arith.constant 0 : index
    %c0_23 = arith.constant 0 : index
    %27 = vector.load %arg6[%c0_22, %c0_23] : memref<128x128xbf16, #tpu.memory_space<vmem>>, vector<128x128xbf16>
    %cst_24 = arith.constant dense<0.000000e+00> : vector<16x128xf32>
    %28 = tpu.matmul %26, %27, %cst_24 {dimension_numbers = #tpu.dot_dimension_numbers<[1], [0], [0], [1], [0, 0, 1, 1], [], []>} : vector<16x128xbf16>, vector<128x128xbf16>, vector<16x128xf32> -> vector<16x128xf32>
    %29 = vector.broadcast %2 : vector<1x128xf32> to vector<16x128xf32>
    %30 = arith.addf %28, %29 : vector<16x128xf32>
    %31 = arith.truncf %19 : vector<32x128xf32> to vector<32x128xbf16>
    %c0_25 = arith.constant 0 : index
    %c0_26 = arith.constant 0 : index
    %32 = vector.load %arg7[%c0_25, %c0_26] : memref<128x128xbf16, #tpu.memory_space<vmem>>, vector<128x128xbf16>
    %cst_27 = arith.constant dense<0.000000e+00> : vector<32x128xf32>
    %33 = tpu.matmul %31, %32, %cst_27 {dimension_numbers = #tpu.dot_dimension_numbers<[1], [0], [0], [1], [0, 0, 1, 1], [], []>} : vector<32x128xbf16>, vector<128x128xbf16>, vector<32x128xf32> -> vector<32x128xf32>
    %34 = vector.broadcast %3 : vector<1x128xf32> to vector<32x128xf32>
    %35 = arith.addf %33, %34 : vector<32x128xf32>
    %c0_28 = arith.constant 0 : index
    %c0_29 = arith.constant 0 : index
    %36 = vector.load %arg8[%c0_28, %c0_29] : memref<128x128xbf16, #tpu.memory_space<vmem>>, vector<128x128xbf16>
    %cst_30 = arith.constant dense<0.000000e+00> : vector<32x128xf32>
    %37 = tpu.matmul %31, %36, %cst_30 {dimension_numbers = #tpu.dot_dimension_numbers<[1], [0], [0], [1], [0, 0, 1, 1], [], []>} : vector<32x128xbf16>, vector<128x128xbf16>, vector<32x128xf32> -> vector<32x128xf32>
    %38 = vector.broadcast %4 : vector<1x128xf32> to vector<32x128xf32>
    %39 = arith.addf %37, %38 : vector<32x128xf32>
    %40 = vector.shape_cast %24 : vector<2x128xf32> to vector<2x1x128xf32>
    %41 = vector.shape_cast %30 : vector<16x128xf32> to vector<2x8x128xf32>
    %42 = vector.shape_cast %35 : vector<32x128xf32> to vector<2x16x128xf32>
    %43 = vector.shape_cast %39 : vector<32x128xf32> to vector<2x16x128xf32>
    "tpu.trace_start"() <{level = 10 : i32, message = "bqd,bkd->bqk"}> : () -> ()
    %cst_31 = arith.constant dense<0.000000e+00> : vector<2x1x8xf32>
    %44 = tpu.matmul %40, %41, %cst_31 {dimension_numbers = #tpu.dot_dimension_numbers<[2], [2], [1], [1], [0, 0, 0, 1, 1, 1], [0], [0]>} : vector<2x1x128xf32>, vector<2x8x128xf32>, vector<2x1x8xf32> -> vector<2x1x8xf32>
    "tpu.trace_stop"() : () -> ()
    %cst_32 = arith.constant 7.812500e-03 : f32
    %45 = vector.broadcast %cst_32 : f32 to vector<2x1x8xf32>
    %46 = arith.mulf %44, %45 : vector<2x1x8xf32>
    "tpu.trace_start"() <{level = 10 : i32, message = "bqk,bkd->bqd"}> : () -> ()
    %cst_33 = arith.constant dense<0.000000e+00> : vector<2x1x128xf32>
    %47 = tpu.matmul %46, %41, %cst_33 {dimension_numbers = #tpu.dot_dimension_numbers<[2], [1], [1], [2], [0, 0, 0, 1, 1, 2], [0], [0]>} : vector<2x1x8xf32>, vector<2x8x128xf32>, vector<2x1x128xf32> -> vector<2x1x128xf32>
    "tpu.trace_stop"() : () -> ()
    "tpu.trace_start"() <{level = 10 : i32, message = "bqd,bkd->bqk"}> : () -> ()
    %cst_34 = arith.constant dense<0.000000e+00> : vector<2x1x16xf32>
    %48 = tpu.matmul %47, %42, %cst_34 {dimension_numbers = #tpu.dot_dimension_numbers<[2], [2], [1], [1], [0, 0, 0, 1, 1, 1], [0], [0]>} : vector<2x1x128xf32>, vector<2x16x128xf32>, vector<2x1x16xf32> -> vector<2x1x16xf32>
    "tpu.trace_stop"() : () -> ()
    %cst_35 = arith.constant dense<0xFF800000> : vector<2x1xf32>
    %49 = vector.multi_reduction <maximumf>, %48, %cst_35 [2] : vector<2x1x16xf32> to vector<2x1xf32>
    %50 = vector.shape_cast %49 : vector<2x1xf32> to vector<2x1x1xf32>
    %51 = vector.broadcast %50 : vector<2x1x1xf32> to vector<2x1x16xf32>
    %52 = arith.subf %48, %51 : vector<2x1x16xf32>
    %53 = math.exp %52 : vector<2x1x16xf32>
    %cst_36 = arith.constant dense<0.000000e+00> : vector<2x1xf32>
    %54 = vector.multi_reduction <add>, %53, %cst_36 [2] : vector<2x1x16xf32> to vector<2x1xf32>
    %55 = vector.shape_cast %54 : vector<2x1xf32> to vector<2x1x1xf32>
    %56 = tpu.reciprocal %55 {approx = true} : vector<2x1x1xf32> -> vector<2x1x1xf32>
    %57 = vector.broadcast %56 : vector<2x1x1xf32> to vector<2x1x16xf32>
    %58 = arith.mulf %53, %57 : vector<2x1x16xf32>
    "tpu.trace_start"() <{level = 10 : i32, message = "bqk,bkd->bqd"}> : () -> ()
    %cst_37 = arith.constant dense<0.000000e+00> : vector<2x1x128xf32>
    %59 = tpu.matmul %58, %43, %cst_37 {dimension_numbers = #tpu.dot_dimension_numbers<[2], [1], [1], [2], [0, 0, 0, 1, 1, 2], [0], [0]>} : vector<2x1x16xf32>, vector<2x16x128xf32>, vector<2x1x128xf32> -> vector<2x1x128xf32>
    "tpu.trace_stop"() : () -> ()
    %c0_38 = arith.constant 0 : index
    %c0_39 = arith.constant 0 : index
    %c0_40 = arith.constant 0 : index
    %60 = vector.load %arg10[%c0_38, %c0_39, %c0_40] : memref<2x1x128xf32, #tpu.memory_space<vmem>>, vector<2x1x128xf32>
    tpu.vector_store %arg10[%c0_38, %c0_39, %c0_40], %59 {strides = array<i32>} : memref<2x1x128xf32, #tpu.memory_space<vmem>>, vector<2x1x128xf32>,
    return
  }
  func.func @transform_0(%arg0: i32) -> (i32, i32, i32) {
    %c0_i32 = arith.constant 0 : i32
    %c0_i32_0 = arith.constant 0 : i32
    %c0_i32_1 = arith.constant 0 : i32
    return %arg0, %c0_i32, %c0_i32_0 : i32, i32, i32
  }
  func.func @transform_1(%arg0: i32) -> (i32, i32, i32) {
    %c0_i32 = arith.constant 0 : i32
    %c0_i32_0 = arith.constant 0 : i32
    %c0_i32_1 = arith.constant 0 : i32
    return %arg0, %c0_i32, %c0_i32_0 : i32, i32, i32
  }
  func.func @transform_2(%arg0: i32) -> (i32, i32, i32) {
    %c0_i32 = arith.constant 0 : i32
    %c0_i32_0 = arith.constant 0 : i32
    %c0_i32_1 = arith.constant 0 : i32
    return %arg0, %c0_i32, %c0_i32_0 : i32, i32, i32
  }
  func.func @transform_3(%arg0: i32) -> (i32, i32) {
    %c0_i32 = arith.constant 0 : i32
    %c0_i32_0 = arith.constant 0 : i32
    %c0_i32_1 = arith.constant 0 : i32
    return %c0_i32, %c0_i32_0 : i32, i32
  }
  func.func @transform_4(%arg0: i32) -> (i32, i32) {
    %c0_i32 = arith.constant 0 : i32
    %c0_i32_0 = arith.constant 0 : i32
    %c0_i32_1 = arith.constant 0 : i32
    return %c0_i32, %c0_i32_0 : i32, i32
  }
  func.func @transform_5(%arg0: i32) -> (i32, i32) {
    %c0_i32 = arith.constant 0 : i32
    %c0_i32_0 = arith.constant 0 : i32
    %c0_i32_1 = arith.constant 0 : i32
    return %c0_i32, %c0_i32_0 : i32, i32
  }
  func.func @transform_6(%arg0: i32) -> (i32, i32) {
    %c0_i32 = arith.constant 0 : i32
    %c0_i32_0 = arith.constant 0 : i32
    %c0_i32_1 = arith.constant 0 : i32
    return %c0_i32, %c0_i32_0 : i32, i32
  }
  func.func @transform_7(%arg0: i32) -> (i32, i32) {
    %c0_i32 = arith.constant 0 : i32
    %c0_i32_0 = arith.constant 0 : i32
    %c0_i32_1 = arith.constant 0 : i32
    return %c0_i32, %c0_i32_0 : i32, i32
  }
  func.func @transform_8(%arg0: i32) -> (i32, i32) {
    %c0_i32 = arith.constant 0 : i32
    %c0_i32_0 = arith.constant 0 : i32
    %c0_i32_1 = arith.constant 0 : i32
    return %c0_i32, %c0_i32_0 : i32, i32
  }
  func.func @transform_9(%arg0: i32) -> (i32, i32, i32) {
    %c0_i32 = arith.constant 0 : i32
    %c0_i32_0 = arith.constant 0 : i32
    %c0_i32_1 = arith.constant 0 : i32
    return %arg0, %c0_i32, %c0_i32_0 : i32, i32, i32
  }
}

</mosaic_0001>

<bundles_post_ra>
// kernel: tpu_custom_call.1
= control target key start
LH: loop header
LB: loop body
LE: loop exit
PB: predicated region body
PF: predicated region fallthrough
CT: control target
= control target key end

     0   :  { %14 = vsyncpa [#allocation3], 0  ;;  %s2339_s0 = inlined_call_operand.vmem [shape: bf16[2,1,256], index: 0, kind: input, shape index: {}]   ;;  %s2340_s1 = inlined_call_operand.hbm [shape: bf16[2,16,256], index: 1, kind: input, shape index: {}]   ;;  %s2341_s2 = inlined_call_operand.vmem [shape: bf16[2,8,128], index: 2, kind: input, shape index: {}]   ;;  %s2342_s3 = inlined_call_operand.hbm [shape: bf16[256,128], index: 3, kind: input, shape index: {}]   ;;  %s2343_s4 = inlined_call_operand.hbm [shape: bf16[128,128], index: 4, kind: input, shape index: {}]   ;;  %s2344_s5 = inlined_call_operand.hbm [shape: bf16[128,128], index: 5, kind: input, shape index: {}]   ;;  %s2345_s6 = inlined_call_operand.hbm [shape: bf16[128,128], index: 6, kind: input, shape index: {}]   ;;  %s2346_s7 = inlined_call_operand.hbm [shape: bf16[128,128], index: 7, kind: input, shape index: {}]   ;;  %s2347_s8 = inlined_call_operand.vmem [shape: f32[5,128], index: 8, kind: input, shape index: {}]   ;;  %s2348_s9 = inlined_call_operand.hbm [shape: f32[2,1,128], index: 9, kind: output, shape index: {}]  }
   0x1   :  { %15 = vsyncpa [#allocation6], 0 }
   0x2   :  { %16 = vsyncpa [#allocation9], 0 }
   0x3   :  { %17 = vsyncpa [#allocation12], 0 }
   0x4   :  { %18 = vsyncpa [#allocation4], 0  ;;  %s2096_s30 = smov [#allocation5]   ;;  %s1932_s13 = scalar_lea.hbm %s2342_s3, 2048 }
   0x5   :  { %s40_s10 = sshll.u32 %s2096_s30, 4  ;;  %p1933_p0 = scmp.ne.s32.totalorder %s2342_s3, %s1932_s13  ;;  %s41_s10 = int_to_ptr.vmem [resolvable:$true] %s40_s10 }
   0x6   :  { %p1936_p1 = scmp.lt.u32.totalorder %s1932_s13, %s2342_s3 }
   0x8   :  { %p1938_p2 = pnand %p1936_p1, %p1933_p0 }
   0xa   :  { %1941 = shalt.err (!%p1938_p2)
}
   0xb   :  { %s1942_s18 = scalar_lea.vmem %s41_s10, 2048  ;;  %p1947_p4 = scmp.lt.s32.totalorder %s41_s10, %s41_s10 }
   0xc   :  { %p1943_p3 = scmp.ne.s32.totalorder %s41_s10, %s1942_s18  ;;  %p1948_p5 = scmp.lt.s32.totalorder %s1942_s18, %s1942_s18 }
   0xe   :  { %p1949_p6 = por %p1948_p5, %p1947_p4 }
  0x10   :  { %p1950_p7 = pnand %p1949_p6, %p1943_p3 }
  0x12   :  { %1953 = shalt.err (!%p1950_p7)
}
  0x13   :  { %s2097_s19 = smov 64   ;;  %s2098_s20 = smov 4  }
  0x14   :  { %46 = dma.hbm_to_vmem [thread:$0]  %s2342_s3, 2048, %s41_s10, [#allocation6], %s2097_s19, %s2097_s19, %s2098_s20  }
  0x15   :  { %s2099_s23 = smov [#allocation8]   ;;  %s2100_s25 = smov [#allocation2]  }
  0x16   :  { %s64_s24 = sshll.u32 %s2099_s23, 4  ;;  %s26_s26 = sshll.u32 %s2100_s25, 4  ;;  %s65_s24 = int_to_ptr.vmem [resolvable:$true] %s64_s24  ;;  %s27_s26 = int_to_ptr.vmem [resolvable:$true] %s26_s26 }
  0x17   :  { %s1954_s29 = scalar_lea.hbm %s2344_s5, 1024 }
  0x18   :  { %p1955_p8 = scmp.ne.s32.totalorder %s2344_s5, %s1954_s29  ;;  %p1958_p9 = scmp.lt.u32.totalorder %s1954_s29, %s2344_s5 }
  0x1a   :  { %p1960_p10 = pnand %p1958_p9, %p1955_p8 }
  0x1c   :  { %1963 = shalt.err (!%p1960_p10)
}
  0x1d   :  { %s1964_s3 = scalar_lea.vmem %s65_s24, 1024  ;;  %p1969_p12 = scmp.lt.s32.totalorder %s65_s24, %s65_s24 }
  0x1e   :  { %p1965_p11 = scmp.ne.s32.totalorder %s65_s24, %s1964_s3  ;;  %p1970_p13 = scmp.lt.s32.totalorder %s1964_s3, %s1964_s3 }
  0x20   :  { %p1971_p0 = por %p1970_p13, %p1969_p12 }
  0x22   :  { %p1972_p1 = pnand %p1971_p0, %p1965_p11 }
  0x24   :  { %1975 = shalt.err (!%p1972_p1)
}
  0x25   :  { %70 = dma.hbm_to_vmem [thread:$0]  %s2344_s5, 1024, %s65_s24, [#allocation9], %s2097_s19, %s2097_s19, %s2098_s20  }
  0x26   :  { %s1976_s17 = scalar_lea.hbm %s2340_s1, 512 }
  0x27   :  { %p1977_p2 = scmp.ne.s32.totalorder %s2340_s1, %s1976_s17  ;;  %p1980_p3 = scmp.lt.u32.totalorder %s1976_s17, %s2340_s1 }
  0x29   :  { %p1982_p4 = pnand %p1980_p3, %p1977_p2 }
  0x2b   :  { %1985 = shalt.err (!%p1982_p4)
}
  0x2c   :  { %s1986_s25 = scalar_lea.vmem %s27_s26, 512  ;;  %p1991_p6 = scmp.lt.s32.totalorder %s27_s26, %s27_s26 }
  0x2d   :  { %p1987_p5 = scmp.ne.s32.totalorder %s27_s26, %s1986_s25  ;;  %p1992_p7 = scmp.lt.s32.totalorder %s1986_s25, %s1986_s25 }
  0x2f   :  { %p1993_p8 = por %p1992_p7, %p1991_p6 }
  0x31   :  { %p1994_p9 = pnand %p1993_p8, %p1987_p5 }
  0x33   :  { %1997 = shalt.err (!%p1994_p9)
}
  0x34   :  { %s2101_s5 = smov 128   ;;  %s2102_s24 = smov 8  }
  0x35   :  { %32 = dma.hbm_to_vmem [thread:$0]  %s2340_s1, 512, %s27_s26, [#allocation3], %s2101_s5, %s2101_s5, %s2102_s24  }
  0x36   :  { %s2103_s29 = smov [#allocation7]   ;;  %s2104_s11 = smov [#allocation10]  }
  0x37   :  { %s52_s30 = sshll.u32 %s2103_s29, 4  ;;  %s76_s12 = sshll.u32 %s2104_s11, 4  ;;  %s53_s30 = int_to_ptr.vmem [resolvable:$true] %s52_s30  ;;  %s77_s12 = int_to_ptr.vmem [resolvable:$true] %s76_s12 }
  0x38   :  { %s1998_s10 = scalar_lea.hbm %s2343_s4, 1024 }
  0x39   :  { %p1999_p10 = scmp.ne.s32.totalorder %s2343_s4, %s1998_s10  ;;  %p2002_p11 = scmp.lt.u32.totalorder %s1998_s10, %s2343_s4 }
  0x3b   :  { %p2004_p12 = pnand %p2002_p11, %p1999_p10 }
  0x3d   :  { %2007 = shalt.err (!%p2004_p12)
}
  0x3e   :  { %s2008_s1 = scalar_lea.vmem %s53_s30, 1024  ;;  %p2013_p0 = scmp.lt.s32.totalorder %s53_s30, %s53_s30 }
  0x3f   :  { %p2009_p13 = scmp.ne.s32.totalorder %s53_s30, %s2008_s1  ;;  %p2014_p1 = scmp.lt.s32.totalorder %s2008_s1, %s2008_s1 }
  0x41   :  { %p2015_p2 = por %p2014_p1, %p2013_p0 }
  0x43   :  { %p2016_p3 = pnand %p2015_p2, %p2009_p13 }
  0x45   :  { %2019 = shalt.err (!%p2016_p3)
}
  0x46   :  { %58 = dma.hbm_to_vmem [thread:$0]  %s2343_s4, 1024, %s53_s30, [#allocation6], %s2097_s19, %s2097_s19, %s2098_s20  }
  0x47   :  { %s2020_s23 = scalar_lea.hbm %s2345_s6, 1024 }
  0x48   :  { %p2021_p4 = scmp.ne.s32.totalorder %s2345_s6, %s2020_s23  ;;  %p2024_p5 = scmp.lt.u32.totalorder %s2020_s23, %s2345_s6 }
  0x4a   :  { %p2026_p6 = pnand %p2024_p5, %p2021_p4 }
  0x4c   :  { %2029 = shalt.err (!%p2026_p6)
}
  0x4d   :  { %s2030_s28 = scalar_lea.vmem %s77_s12, 1024  ;;  %p2035_p8 = scmp.lt.s32.totalorder %s77_s12, %s77_s12 }
  0x4e   :  { %p2031_p7 = scmp.ne.s32.totalorder %s77_s12, %s2030_s28  ;;  %p2036_p9 = scmp.lt.s32.totalorder %s2030_s28, %s2030_s28 }
  0x50   :  { %p2037_p10 = por %p2036_p9, %p2035_p8 }
  0x52   :  { %p2038_p11 = pnand %p2037_p10, %p2031_p7 }
  0x54   :  { %2041 = shalt.err (!%p2038_p11)
}
  0x55   :  { %82 = dma.hbm_to_vmem [thread:$0]  %s2345_s6, 1024, %s77_s12, [#allocation9], %s2097_s19, %s2097_s19, %s2098_s20  }
  0x56   :  { %s2105_s30 = smov [#allocation11]   ;;  %s2042_s10 = scalar_lea.hbm %s2346_s7, 1024 }
  0x57   :  { %s88_s11 = sshll.u32 %s2105_s30, 4  ;;  %p2043_p12 = scmp.ne.s32.totalorder %s2346_s7, %s2042_s10  ;;  %s89_s11 = int_to_ptr.vmem [resolvable:$true] %s88_s11 }
  0x58   :  { %p2046_p13 = scmp.lt.u32.totalorder %s2042_s10, %s2346_s7 }
  0x5a   :  { %p2048_p0 = pnand %p2046_p13, %p2043_p12 }
  0x5c   :  { %2051 = shalt.err (!%p2048_p0)
}
  0x5d   :  { %s2052_s1 = scalar_lea.vmem %s89_s11, 1024  ;;  %p2057_p2 = scmp.lt.s32.totalorder %s89_s11, %s89_s11 }
  0x5e   :  { %p2053_p1 = scmp.ne.s32.totalorder %s89_s11, %s2052_s1  ;;  %p2058_p3 = scmp.lt.s32.totalorder %s2052_s1, %s2052_s1 }
  0x60   :  { %p2059_p4 = por %p2058_p3, %p2057_p2 }
  0x62   :  { %p2060_p5 = pnand %p2059_p4, %p2053_p1 }
  0x64   :  { %2063 = shalt.err (!%p2060_p5)
}
  0x65   :  { %94 = dma.hbm_to_vmem [thread:$0]  %s2346_s7, 1024, %s89_s11, [#allocation12], %s2097_s19, %s2097_s19, %s2098_s20  }
  0x66   :  { %2086 = dma.done.wait [#allocation3], 512  }
  0x67   :  { %2087 = vsyncadd [#allocation3], 4294966784 }
  0x68   :  { %2088 = dma.done.wait [#allocation6], 3072  }
  0x69   :  { %2089 = vsyncadd [#allocation6], 4294964224 }
  0x6a   :  { %2090 = dma.done.wait [#allocation9], 2048  }
  0x6b   :  { %2091 = vsyncadd [#allocation9], 4294965248 }
  0x6c   :  { %2092 = dma.done.wait [#allocation12], 1024  }
  0x6d   :  { %2093 = vsyncadd [#allocation12], 4294966272  ;;  %v1869_v0 = vld [vmem:[#allocation5 + $0x40] sm:$0xff]   ;;  %v1871_v2 = vld [vmem:[#allocation5 + $0x48] sm:$0xff]   ;;  %v2106_v5 = vmov 1966171168   ;;  %v172_v7 = vlaneseq }
  0x6e   :  { %v1870_v1 = vld [vmem:[#allocation5] sm:$0xff]   ;;  %1604 = vmatprep.subr.bf16.mxu0 %v1869_v0  ;;  %1626 = vmatprep.subr.bf16.mxu1 %v1869_v0  ;;  %v1872_v3 = vld [vmem:[#allocation5 + $0x8] sm:$0xff]   ;;  %v1873_v4 = vld [vmem:[#allocation5 + $0x50] sm:$0xff]   ;;  %v170_v6 = vunpack.c.l.s4 %v2106_v5  ;;  %vm210_vm0 = vcmask 1041409   ;;  %v2107_v44 = vmov 0.0   ;;  %vm2108_vm1 = vmmov 0  }
  0x6f   :  { %1605 = vmatpush3.bf16.msra.mxu0 %v1870_v1  ;;  %1627 = vmatpush3.bf16.msra.mxu1 %v1870_v1  ;;  %v1874_v8 = vld [vmem:[#allocation5 + $0x10] sm:$0xff]   ;;  %v1875_v9 = vld [vmem:[#allocation5 + $0x58] sm:$0xff]   ;;  %v173_v11 = vshrl.u32 %v172_v7, 7  ;;  %v1877_v13 = vld [vmem:[#allocation5 + $0x60] sm:$0xff]   ;;  %vm1061_vm2 = vcmask 64512   ;;  %vm1348_vm3 = vcmask 122880  }
  0x70   :  { %1606 = vmatprep.subr.bf16.mxu0 %v1871_v2  ;;  %1628 = vmatprep.subr.bf16.mxu1 %v1871_v2  ;;  %v171_v10 = vunpack.c.0.s8 %v170_v6  ;;  %v1876_v12 = vld [vmem:[#allocation5 + $0x18] sm:$0xff]   ;;  %v1878_v14 = vld [vmem:[#allocation5 + $0x20] sm:$0xff]   ;;  %v1879_v16 = vld [vmem:[#allocation5 + $0x68] sm:$0xff]   ;;  %vm1371_vm4 = vcmask 130048  }
  0x71   :  { %v1541_v17 = vld.sshfl [vmem:[%s2339_s0] sm:$0x11 pattern:$0x75316420]  ;;  %v1887_v22 = vld [vmem:[#allocation2 + $0x4] ss:$8 sps:$4 sm:$0xff]  }
  0x72   :  { %v2250_v15 = vsub.s32 %v171_v10, %v173_v11  ;;  %v1542_v18 = vld.sshfl [vmem:[%s2339_s0 + $0x2] sm:$0x11 pattern:$0x75316420]  ;;  %v168_v19 = vcombine.high %v1541_v17, %v1541_v17  ;;  %v1881_v26 = vld [vmem:[#allocation5 + $0x70] sm:$0xff]   ;;  %411 = vmatprep.mubr.bf16.mxu1 %v1887_v22  ;;  %v1883_v34 = vld [vmem:[#allocation5 + $0x78] sm:$0xff]  }
  0x73   :  { %1607 = vmatpush3.bf16.msra.mxu0 %v1872_v3  ;;  %1629 = vmatpush3.bf16.msra.mxu1 %v1872_v3  ;;  %v190_v20 = vcombine.high %v1542_v18, %v1542_v18  ;;  %v1880_v23 = vld [vmem:[#allocation5 + $0x28] sm:$0xff]   ;;  %v1882_v31 = vld [vmem:[#allocation5 + $0x30] sm:$0xff]   ;;  %v1884_v37 = vld [vmem:[#allocation5 + $0x38] sm:$0xff]  }
  0x74   :  { %1608 = vmatprep.subr.bf16.mxu0 %v1873_v4  ;;  %1630 = vmatprep.subr.bf16.mxu1 %v1873_v4  ;;  %v197_v21 = vrot.slane %v1542_v18, %v2250_v15  ;;  %v182_v24 = vrot.slane %v168_v19, %v2250_v15  ;;  %v175_v25 = vrot.slane %v1541_v17, %v2250_v15  ;;  %v1885_v40 = vld [vmem:[#allocation2] ss:$8 sps:$4 sm:$0xff]   ;;  %v1896_v45 = vld [vmem:[#allocation2 + $0x14] ss:$8 sps:$4 sm:$0xff]   ;;  %v1898_v48 = vld [vmem:[#allocation2 + $0x10] ss:$8 sps:$4 sm:$0xff]  }
  0x75   :  { %v204_v27 = vrot.slane %v190_v20, %v2250_v15  ;;  %v1888_v42 = vld [vmem:[#allocation8] sm:$0xff]   ;;  %v1889_v46 = vld [vmem:[#allocation8 + $0x8] sm:$0xff]   ;;  %v1891_v49 = vld [vmem:[#allocation8 + $0x10] sm:$0xff]  }
  0x76   :  { %v207_v28 = vunpack.c.l.b16 %v197_v21  ;;  %v206_v29 = vunpack.c.l.b16 %v182_v24  ;;  %v205_v32 = vunpack.c.l.b16 %v175_v25  ;;  %v1890_v43 = vld [vmem:[#allocation7] sm:$0xff]   ;;  %v1892_v47 = vld [vmem:[#allocation7 + $0x8] sm:$0xff]   ;;  %v1894_v50 = vld [vmem:[#allocation7 + $0x10] sm:$0xff]  }
  0x77   :  { %1609 = vmatpush3.bf16.msra.mxu0 %v1874_v8  ;;  %1631 = vmatpush3.bf16.msra.mxu1 %v1874_v8  ;;  %v208_v30 = vunpack.c.l.b16 %v204_v27  ;;  %v1893_v51 = vld [vmem:[#allocation8 + $0x18] sm:$0xff]   ;;  %v1895_v53 = vld [vmem:[#allocation8 + $0x20] sm:$0xff]   ;;  %v1900_v55 = vld [vmem:[#allocation8 + $0x28] sm:$0xff]  }
  0x78   :  { %1610 = vmatprep.subr.bf16.mxu0 %v1875_v9  ;;  %1632 = vmatprep.subr.bf16.mxu1 %v1875_v9  ;;  %v209_v33 = vrot.slane %v207_v28, 7  ;;  %v1899_v52 = vld [vmem:[#allocation7 + $0x18] sm:$0xff]   ;;  %v1901_v54 = vld [vmem:[#allocation7 + $0x20] sm:$0xff]   ;;  %v1903_v56 = vld [vmem:[#allocation7 + $0x28] sm:$0xff]  }
  0x79   :  { %v212_v35 = vrot.slane %v208_v30, 7  ;;  %v1902_v57 = vld [vmem:[#allocation8 + $0x30] sm:$0xff]   ;;  %v1904_v58 = vld [vmem:[#allocation8 + $0x38] sm:$0xff]   ;;  %v1906_v61 = vld [vmem:[%s2341_s2] sm:$0xff]  }
  0x7a   :  { %v211_v39 = vsel %vm210_vm0, %v209_v33, %v205_v32  ;;  %v1905_v59 = vld [vmem:[#allocation7 + $0x30] sm:$0xff]   ;;  %v1907_v60 = vld [vmem:[#allocation7 + $0x38] sm:$0xff]   ;;  %v1908_v62 = vld [vmem:[#allocation10] sm:$0xff]  }
  0x7b   :  { %1611 = vmatpush3.bf16.msra.mxu0 %v1876_v12  ;;  %1633 = vmatpush3.bf16.msra.mxu1 %v1876_v12  ;;  %v213_v36 = vsel %vm210_vm0, %v212_v35, %v206_v29  ;;  %v214_v41 = vpack.c.b16 %v211_v39, %v211_v39  ;;  %v1909_v63 = vld [vmem:[#allocation11] sm:$0xff]   ;;  %v1911_v0 = vld [vmem:[#allocation11 + $0x8] sm:$0xff]   ;;  %v1913_v1 = vld [vmem:[#allocation11 + $0x10] sm:$0xff]  }
  0x7c   :  { %1612 = vmatprep.subr.bf16.mxu0 %v1877_v13  ;;  %1634 = vmatprep.subr.bf16.mxu1 %v1877_v13  ;;  %v215_v38 = vpack.c.b16 %v213_v36, %v213_v36  ;;  %v1915_v2 = vld [vmem:[#allocation11 + $0x18] sm:$0xff]   ;;  %v1917_v3 = vld [vmem:[#allocation11 + $0x20] sm:$0xff]   ;;  %v1919_v4 = vld [vmem:[#allocation11 + $0x28] sm:$0xff]  }
  0x7d   :  { %v1921_v5 = vld [vmem:[#allocation11 + $0x30] sm:$0xff]   ;;  %v1923_v6 = vld [vmem:[#allocation11 + $0x38] sm:$0xff]   ;;  %v1540_v9 = vld [vmem:[%s2347_s8] ss:$0 sm:$0xff] }
  0x7e   :  { %346 = vmatprep.mubr.bf16.mxu0 %v215_v38  ;;  %v1910_v27 = vld [vmem:[#allocation10 + $0x8] sm:$0xff]   ;;  %v1914_v39 = vld [vmem:[#allocation10 + $0x18] sm:$0xff]  }
  0x7f   :  { %1613 = vmatpush3.bf16.msra.mxu0 %v1878_v14  ;;  %1635 = vmatpush3.bf16.msra.mxu1 %v1878_v14 }
  0x80   :  { %1614 = vmatprep.subr.bf16.mxu0 %v1879_v16  ;;  %1636 = vmatprep.subr.bf16.mxu1 %v1879_v16 }
  0x83   :  { %1615 = vmatpush3.bf16.msra.mxu0 %v1880_v23  ;;  %1637 = vmatpush3.bf16.msra.mxu1 %v1880_v23 }
  0x84   :  { %1616 = vmatprep.subr.bf16.mxu0 %v1881_v26  ;;  %1638 = vmatprep.subr.bf16.mxu1 %v1881_v26 }
  0x87   :  { %1617 = vmatpush3.bf16.msra.mxu0 %v1882_v31  ;;  %1639 = vmatpush3.bf16.msra.mxu1 %v1882_v31 }
  0x88   :  { %1618 = vmatprep.subr.bf16.mxu0 %v1883_v34  ;;  %1640 = vmatprep.subr.bf16.mxu1 %v1883_v34  ;;  %v1912_v34 = vld [vmem:[#allocation10 + $0x10] sm:$0xff]  }
  0x8b   :  { %1619 = vmatpush3.bf16.msra.mxu0 %v1884_v37  ;;  %1641 = vmatpush3.bf16.msra.mxu1 %v1884_v37 }
  0x8c   :  { %1732 = vmatprep.subr.bf16.mxu1 %v2107_v44  ;;  %1712 = vmatprep.subr.bf16.mxu0 %v2107_v44 }
  0x8e   :  { %347 = vmatmul.mubr.bf16.vlgmr.msra.gmra.mrb[0].mxu0 %v214_v41  ;;  %412 = vmatmul.mubr.bf16.vlgmr.msra.gmra.mrb[0].mxu1 %v1885_v40 }
  0x8f   :  { %1733 = vmatpush3.bf16.msra.mxu1 %v1888_v42  ;;  %1713 = vmatpush3.bf16.msra.mxu0 %v1890_v43  ;;  %v1916_v42 = vld [vmem:[#allocation10 + $0x20] sm:$0xff]   ;;  %v1918_v43 = vld [vmem:[#allocation10 + $0x28] sm:$0xff]  }
  0x90   :  { %1734 = vmatprep.subr.bf16.mxu1 %v2107_v44  ;;  %1714 = vmatprep.subr.bf16.mxu0 %v2107_v44 }
  0x91   :  { %419 = vmatprep.mubr.bf16.mxu1 %v1896_v45  ;;  %1728 = vmatprep.mubr.msk.bf16.mxu0 %vm2108_vm1, %v2107_v44  ;;  %v1920_v45 = vld [vmem:[#allocation10 + $0x30] sm:$0xff]  }
  0x93   :  { %1735 = vmatpush3.bf16.msra.mxu1 %v1889_v46  ;;  %1715 = vmatpush3.bf16.msra.mxu0 %v1892_v47  ;;  %v1922_v46 = vld [vmem:[#allocation10 + $0x38] sm:$0xff]   ;;  %v1572_v47 = vld [vmem:[%s2347_s8 + $0x2] ss:$0 sm:$0xff] }
  0x94   :  { %1736 = vmatprep.subr.bf16.mxu1 %v2107_v44  ;;  %1716 = vmatprep.subr.bf16.mxu0 %v2107_v44 }
  0x96   :  { %420 = vmatmul.mubr.bf16.gmra.mrb[4].mxu1 %v1898_v48 }
  0x97   :  { %1737 = vmatpush3.bf16.msra.mxu1 %v1891_v49  ;;  %1717 = vmatpush3.bf16.msra.mxu0 %v1894_v50 }
  0x98   :  { %1738 = vmatprep.subr.bf16.mxu1 %v2107_v44  ;;  %1718 = vmatprep.subr.bf16.mxu0 %v2107_v44 }
  0x99   :  { %1748 = vmatprep.mubr.msk.bf16.mxu1 %vm2108_vm1, %v2107_v44 }
  0x9b   :  { %1739 = vmatpush3.bf16.msra.mxu1 %v1893_v51  ;;  %1719 = vmatpush3.bf16.msra.mxu0 %v1899_v52 }
  0x9c   :  { %1740 = vmatprep.subr.bf16.mxu1 %v2107_v44  ;;  %1720 = vmatprep.subr.bf16.mxu0 %v2107_v44 }
  0x9f   :  { %1741 = vmatpush3.bf16.msra.mxu1 %v1895_v53  ;;  %1721 = vmatpush3.bf16.msra.mxu0 %v1901_v54  ;;  %v1563_v54 = vld [vmem:[%s2347_s8 + $0x1] ss:$0 sm:$0xff] }
  0xa0   :  { %1742 = vmatprep.subr.bf16.mxu1 %v2107_v44  ;;  %1722 = vmatprep.subr.bf16.mxu0 %v2107_v44 }
  0xa3   :  { %1743 = vmatpush3.bf16.msra.mxu1 %v1900_v55  ;;  %1723 = vmatpush3.bf16.msra.mxu0 %v1903_v56 }
  0xa4   :  { %1744 = vmatprep.subr.bf16.mxu1 %v2107_v44  ;;  %1724 = vmatprep.subr.bf16.mxu0 %v2107_v44 }
  0xa7   :  { %1745 = vmatpush3.bf16.msra.mxu1 %v1902_v57  ;;  %1725 = vmatpush3.bf16.msra.mxu0 %v1905_v59 }
  0xa8   :  { %1746 = vmatprep.subr.bf16.mxu1 %v2107_v44  ;;  %1726 = vmatprep.subr.bf16.mxu0 %v2107_v44 }
  0xab   :  { %1747 = vmatpush3.bf16.msra.mxu1 %v1904_v58  ;;  %1727 = vmatpush3.bf16.msra.mxu0 %v1907_v60 }
  0xac   :  { %1752 = vmatprep.subr.bf16.mxu0 %v1908_v62  ;;  %1772 = vmatprep.subr.bf16.mxu1 %v1909_v63 }
  0xae   :  { %1749 = vmatmul.mubr.bf16.vlgmr.msra.gmra.mrb[8].mxu1 %v1906_v61 }
  0xaf   :  { %1773 = vmatpush3.bf16.msra.mxu1 %v1909_v63 }
  0xb0   :  { %1774 = vmatprep.subr.bf16.mxu1 %v1911_v0 }
  0xb3   :  { %1775 = vmatpush3.bf16.msra.mxu1 %v1911_v0  ;;  %v1591_v0 = vld [vmem:[%s2347_s8 + $0x4] ss:$0 sm:$0xff] }
  0xb4   :  { %1776 = vmatprep.subr.bf16.mxu1 %v1913_v1 }
  0xb7   :  { %1777 = vmatpush3.bf16.msra.mxu1 %v1913_v1 }
  0xb8   :  { %1778 = vmatprep.subr.bf16.mxu1 %v1915_v2 }
  0xbb   :  { %1779 = vmatpush3.bf16.msra.mxu1 %v1915_v2 }
  0xbc   :  { %1780 = vmatprep.subr.bf16.mxu1 %v1917_v3 }
  0xbf   :  { %1781 = vmatpush3.bf16.msra.mxu1 %v1917_v3 }
  0xc0   :  { %1782 = vmatprep.subr.bf16.mxu1 %v1919_v4 }
  0xc3   :  { %1783 = vmatpush3.bf16.msra.mxu1 %v1919_v4 }
  0xc4   :  { %1784 = vmatprep.subr.bf16.mxu1 %v1921_v5 }
  0xc7   :  { %1785 = vmatpush3.bf16.msra.mxu1 %v1921_v5 }
  0xc8   :  { %1786 = vmatprep.subr.bf16.mxu1 %v1923_v6 }
  0xcb   :  { %1787 = vmatpush3.bf16.msra.mxu1 %v1923_v6 }
  0xcc   :  { %1797 = vmatprep.subr.mxu1 %v2107_v44 }
 0x161   :  { %v1620_v7 = vpop.f32.mrb[0].mxu0  ;;  %v1642_v8 = vpop.f32.mrb[0].mxu1 }
 0x162   :  { %v1621_v10 = vpop.f32.mrb[1].mxu0  ;;  %v1643_v11 = vpop.f32.mrb[1].mxu1 }
 0x163   :  { %v1622_v12 = vadd.f32 %v1621_v10, %v1620_v7  ;;  %v1623_v13 = vpop.f32.mrb[2].mxu0  ;;  %v1644_v14 = vadd.f32 %v1643_v11, %v1642_v8  ;;  %v1645_v16 = vpop.f32.mrb[2].mxu1  ;;  %v1582_v10 = vld [vmem:[%s2347_s8 + $0x3] ss:$0 sm:$0xff]  ;;  %s2110_s8 = smov [#allocation13]  }
 0x164   :  { %v1624_v17 = vpop.f32.mrb[3].mxu0  ;;  %v1646_v18 = vpop.f32.mrb[3].mxu1  ;;  %s1525_s29 = sshll.u32 %s2110_s8, 4  ;;  %s1526_s29 = int_to_ptr.vmem [resolvable:$true] %s1525_s29 }
 0x165   :  { %v349_v19 = vadd.f32 %v1622_v12, %v1540_v9  ;;  %v414_v20 = vadd.f32 %v1644_v14, %v1540_v9  ;;  %v1647_v21 = vadd.f32 %v1646_v18, %v1645_v16  ;;  %s2064_s30 = scalar_lea.vmem %s1526_s29, 32  ;;  %p2069_p7 = scmp.lt.s32.totalorder %s1526_s29, %s1526_s29 }
 0x166   :  { %p2065_p6 = scmp.ne.s32.totalorder %s1526_s29, %s2064_s30  ;;  %p2070_p8 = scmp.lt.s32.totalorder %s2064_s30, %s2064_s30 }
 0x167   :  { %v354_v22 = vmax.f32 %v349_v19, 0.0  ;;  %v428_v23 = vmax.f32 %v414_v20, 0.0  ;;  %v417_v24 = vadd.f32 %v1647_v21, %v1540_v9 }
 0x168   :  { %p2071_p9 = por %p2070_p8, %p2069_p7 }
 0x169   :  { %v432_v25 = vpack.c.bf16 %v354_v22, %v354_v22  ;;  %v429_v26 = vmax.f32 %v417_v24, 0.0  ;;  %v1648_v28 = vpop.f32.mrb[4].mxu1  ;;  %v2109_v22 = vmov 0.0|0.0  }
 0x16a   :  { %v1649_v29 = vpop.f32.mrb[5].mxu1  ;;  %p2072_p10 = pnand %p2071_p9, %p2065_p6 }
 0x16b   :  { %1729 = vmatmul.mubr.bf16.vlgmr.msra.gmra.mrb[4].mxu0 %v432_v25  ;;  %v658_v30 = vpack.c.bf16 %v429_v26, %v428_v23  ;;  %v1650_v31 = vadd.f32 %v1649_v29, %v1648_v28  ;;  %v1651_v32 = vpop.f32.mrb[6].mxu1 }
 0x16c   :  { %1753 = vmatpush3.bf16.msra.mxu0 %v1908_v62  ;;  %v1652_v33 = vpop.f32.mrb[7].mxu1 }
 0x16d   :  { %1754 = vmatprep.subr.bf16.mxu0 %v1910_v27  ;;  %1768 = vmatprep.mubr.bf16.mxu0 %v658_v30  ;;  %v422_v35 = vadd.f32 %v1650_v31, %v1540_v9  ;;  %v1653_v36 = vadd.f32 %v1652_v33, %v1651_v32 }
 0x16e   :  { %1788 = vmatprep.mubr.bf16.mxu1 %v658_v30 }
 0x16f   :  { %v430_v37 = vmax.f32 %v422_v35, 0.0  ;;  %v425_v38 = vadd.f32 %v1653_v36, %v1540_v9 }
 0x170   :  { %1755 = vmatpush3.bf16.msra.mxu0 %v1910_v27 }
 0x171   :  { %1756 = vmatprep.subr.bf16.mxu0 %v1912_v34  ;;  %v431_v40 = vmax.f32 %v425_v38, 0.0 }
 0x173   :  { %v659_v41 = vpack.c.bf16 %v431_v40, %v430_v37 }
 0x174   :  { %1757 = vmatpush3.bf16.msra.mxu0 %v1912_v34 }
 0x175   :  { %1758 = vmatprep.subr.bf16.mxu0 %v1914_v39  ;;  %1789 = vmatmul.mubr.bf16.vlgmr.msra.gmra.mrb[12].mxu1 %v659_v41 }
 0x176   :  { %1799 = vmatprep.mubr.msk.f32.mxu1 %vm2108_vm1, %v2107_v44 }
 0x178   :  { %1759 = vmatpush3.bf16.msra.mxu0 %v1914_v39 }
 0x179   :  { %1760 = vmatprep.subr.bf16.mxu0 %v1916_v42 }
 0x17c   :  { %1761 = vmatpush3.bf16.msra.mxu0 %v1916_v42 }
 0x17d   :  { %1762 = vmatprep.subr.bf16.mxu0 %v1918_v43 }
 0x180   :  { %1763 = vmatpush3.bf16.msra.mxu0 %v1918_v43 }
 0x181   :  { %1764 = vmatprep.subr.bf16.mxu0 %v1920_v45  ;;  %v651_v48 = vpop.f32.mrb[8].mxu1 }
 0x182   :  { %v652_v49 = vadd.f32 %v1572_v47, %v651_v48  ;;  %v1750_v50 = vpop.f32.mrb[9].mxu1 }
 0x183   :  { %v654_v51 = vpop.f32.mrb[10].mxu1 }
 0x184   :  { %1765 = vmatpush3.bf16.msra.mxu0 %v1920_v45  ;;  %v655_v52 = vadd.f32 %v1572_v47, %v654_v51  ;;  %v1751_v53 = vpop.f32.mrb[11].mxu1 }
 0x185   :  { %1766 = vmatprep.subr.bf16.mxu0 %v1922_v46 }
 0x186   :  { %1798 = vmatpush3.xpose.msra.mxu1 %v655_v52 }
 0x187   :  { %1807 = vmatprep.subr.mxu1 %v2107_v44 }
 0x188   :  { %1767 = vmatpush3.bf16.msra.mxu0 %v1922_v46 }
 0x189   :  { %1792 = vmatprep.subr.mxu0 %v2107_v44 }
 0x18b   :  { %1769 = vmatmul.mubr.bf16.vlgmr.msra.gmra.mrb[8].mxu0 %v659_v41 }
 0x18c   :  { %1794 = vmatprep.mubr.msk.f32.mxu0 %vm2108_vm1, %v2107_v44 }
 0x191   :  { %1793 = vmatpush3.xpose.msra.mxu0 %v652_v49 }
 0x192   :  { %1802 = vmatprep.subr.mxu0 %v2107_v44 }
 0x23e   :  { %v535_v55 = vpop.f32.mrb[4].mxu0 }
 0x23f   :  { %v536_v56 = vadd.f32 %v1563_v54, %v535_v55  ;;  %v1730_v57 = vpop.f32.mrb[5].mxu0 }
 0x240   :  { %v538_v58 = vpop.f32.mrb[6].mxu0 }
 0x241   :  { %v901_v59 = vrot.slane %v536_v56, %v2250_v15  ;;  %v1731_v60 = vpop.f32.mrb[7].mxu0 }
 0x243   :  { %v902_v61 = vcombine.high %v901_v59, %v901_v59  ;;  %v909_v62 = vrot.slane %v901_v59, %v2250_v15 }
 0x245   :  { %v916_v63 = vrot.slane %v902_v61, %v2250_v15  ;;  %1795 = vmatmul.mubr.f32.vlgmr.msra.gmra.mrb[12].mxu0 %v909_v62 }
 0x246   :  { %1803 = vmatpush3.msra.mxu0 %v652_v49  ;;  %1804 = vmatprep.mubr.msk.f32.mxu0 %vm2108_vm1, %v2107_v44 }
 0x247   :  { %1800 = vmatmul.mubr.f32.vlgmr.msra.gmra.mrb[16].mxu1 %v916_v63  ;;  %1840 = vmatprep.subr.bf16.mxu0 %v2109_v22 }
 0x248   :  { %1808 = vmatpush3.msra.mxu1 %v655_v52  ;;  %v1790_v1 = vpop.f32.mrb[12].mxu1  ;;  %1809 = vmatprep.mubr.msk.f32.mxu1 %vm2108_vm1, %v2107_v44 }
 0x249   :  { %v888_v2 = vadd.f32 %v1790_v1, %v1591_v0  ;;  %v879_v3 = vpop.f32.mrb[13].mxu1  ;;  %1843 = vmatprep.subr.bf16.mxu1 %v2109_v22 }
 0x24a   :  { %v880_v4 = vadd.f32 %v1591_v0, %v879_v3  ;;  %v1791_v5 = vpop.f32.mrb[14].mxu1 }
 0x24b   :  { %v891_v15 = vadd.f32 %v1791_v5, %v1591_v0  ;;  %v882_v6 = vpop.f32.mrb[15].mxu1 }
 0x24c   :  { %v883_v7 = vadd.f32 %v1591_v0, %v882_v6 }
 0x24d   :  { %v1850_v8 = vpack.c.bf16 %v891_v15, %v888_v2 }
 0x24e   :  { %v1847_v9 = vpack.c.bf16 %v883_v7, %v880_v4 }
 0x25e   :  { %v1770_v11 = vpop.f32.mrb[8].mxu0 }
 0x25f   :  { %v771_v12 = vadd.f32 %v1770_v11, %v1582_v10  ;;  %v762_v13 = vpop.f32.mrb[9].mxu0 }
 0x260   :  { %v763_v14 = vadd.f32 %v1582_v10, %v762_v13  ;;  %v1771_v16 = vpop.f32.mrb[10].mxu0 }
 0x261   :  { %v774_v17 = vadd.f32 %v1771_v16, %v1582_v10  ;;  %v765_v18 = vpop.f32.mrb[11].mxu0 }
 0x262   :  { %v766_v19 = vadd.f32 %v1582_v10, %v765_v18 }
 0x263   :  { %v1844_v20 = vpack.c.bf16 %v774_v17, %v771_v12 }
 0x264   :  { %v1841_v21 = vpack.c.bf16 %v766_v19, %v763_v14 }
 0x318   :  { %v985_v23 = vpop.f32.mrb[12].mxu0 }
 0x319   :  { %v1059_v24 = vmul.f32 0.0078125, %v985_v23  ;;  %v1796_v25 = vpop.f32.mrb[13].mxu0 }
 0x31a   :  { %v1055_v26 = vpop.f32.mrb[16].mxu1 }
 0x31b   :  { %v1060_v27 = vmul.f32 0.0078125, %v1055_v26  ;;  %v1801_v28 = vpop.f32.mrb[17].mxu1  ;;  %1805 = vmatmul.mubr.msk.f32.vlgmr.msra.gmra.mrb[14].mxu0 %vm1061_vm2, %v1059_v24 }
 0x31c   :  { %1842 = vmatpush3.bf16.xpose.msra.mxu0 %v1841_v21  ;;  %1816 = vmatprep.mubr.msk.f32.mxu0 %vm2108_vm1, %v2107_v44 }
 0x31d   :  { %1810 = vmatmul.mubr.msk.f32.vlgmr.msra.gmra.mrb[18].mxu1 %vm1061_vm2, %v1060_v27  ;;  %1846 = vmatprep.subr.bf16.mxu0 %v2109_v22 }
 0x31e   :  { %1845 = vmatpush3.bf16.xpose.msra.mxu1 %v1844_v20  ;;  %1823 = vmatprep.mubr.msk.f32.mxu1 %vm2108_vm1, %v2107_v44 }
 0x31f   :  { %1849 = vmatprep.subr.bf16.mxu1 %v2109_v22 }
 0x3ee   :  { %v1131_v29 = vpop.f32.mrb[14].mxu0 }
 0x3ef   :  { %v1806_v30 = vpop.f32.mrb[15].mxu0  ;;  %1817 = vmatmul.mubr.f32.vlgmr.msra.gmra.mrb[16].mxu0 %v1131_v29 }
 0x3f0   :  { %1848 = vmatpush3.bf16.msra.mxu0 %v1847_v9  ;;  %v1204_v31 = vpop.f32.mrb[18].mxu1  ;;  %1830 = vmatprep.mubr.msk.f32.mxu0 %vm2108_vm1, %v2107_v44 }
 0x3f1   :  { %v1811_v32 = vpop.f32.mrb[19].mxu1  ;;  %1824 = vmatmul.mubr.f32.vlgmr.msra.gmra.mrb[20].mxu1 %v1204_v31 }
 0x3f2   :  { %1851 = vmatpush3.bf16.msra.mxu1 %v1850_v8  ;;  %1837 = vmatprep.mubr.msk.f32.mxu1 %vm2108_vm1, %v2107_v44 }
 0x4c2   :  { %v1274_v33 = vpop.f32.mrb[16].mxu0 }
 0x4c3   :  { %v1818_v34 = vpop.f32.mrb[17].mxu0  ;;  %v1349_v35 = vsel %vm1348_vm3, %v1274_v33, -inf }
 0x4c4   :  { %v1344_v36 = vpop.f32.mrb[20].mxu1  ;;  %1350 = vmax.xlane.f32.xlu0 %v1349_v35 }
 0x4c5   :  { %v1825_v37 = vpop.f32.mrb[21].mxu1  ;;  %v1352_v38 = vsel %vm1348_vm3, %v1344_v36, -inf }
 0x4c8   :  { %1353 = vmax.xlane.f32.xlu0 %v1352_v38 }
 0x551   :  { %v1351_v39 = vpop.xlane.xlu0 %1350 }
 0x552   :  { %v1355_v40 = vsub.f32 %v1274_v33, %v1351_v39 }
 0x554   :  { %v1357_v41 = vmul.f32 1.442695, %v1355_v40 }
 0x555   :  { %v1354_v42 = vpop.xlane.xlu0 %1353 }
 0x556   :  { %1924 = vpow2.f32 %v1357_v41  ;;  %v1356_v43 = vsub.f32 %v1344_v36, %v1354_v42 }
 0x558   :  { %v1359_v45 = vmul.f32 1.442695, %v1356_v43 }
 0x55a   :  { %1926 = vpow2.f32 %v1359_v45 }
 0x560   :  { %v1925_v44 = vpop.eup %1924 }
 0x561   :  { %v1361_v46 = vsel %vm1348_vm3, %v1925_v44, 0.0 }
 0x562   :  { %1362 = vadd.xlane.f32.xlu1 %v1361_v46 }
 0x564   :  { %v1927_v47 = vpop.eup %1926 }
 0x565   :  { %v1364_v48 = vsel %vm1348_vm3, %v1927_v47, 0.0 }
 0x566   :  { %1365 = vadd.xlane.f32.xlu1 %v1364_v48 }
 0x5ef   :  { %v1363_v49 = vpop.xlane.xlu1 %1362 }
 0x5f0   :  { %1928 = vrcp.f32 %v1363_v49 }
 0x5f3   :  { %v1366_v50 = vpop.xlane.xlu1 %1365 }
 0x5f4   :  { %1930 = vrcp.f32 %v1366_v50 }
 0x5fa   :  { %v1929_v51 = vpop.eup %1928 }
 0x5fb   :  { %v1369_v52 = vmul.f32 %v1929_v51, %v1925_v44 }
 0x5fd   :  { %1831 = vmatmul.mubr.msk.f32.vlgmr.msra.gmra.mrb[18].mxu0 %vm1371_vm4, %v1369_v52 }
 0x5fe   :  { %v1931_v53 = vpop.eup %1930 }
 0x5ff   :  { %v1370_v54 = vmul.f32 %v1931_v53, %v1927_v47 }
 0x601   :  { %1838 = vmatmul.mubr.msk.f32.vlgmr.msra.gmra.mrb[22].mxu1 %vm1371_vm4, %v1370_v54 }
 0x6d0   :  { %v1441_v55 = vpop.f32.mrb[18].mxu0 }
 0x6d1   :  { %1518 = vst [vmem:[#allocation13] sm:$0x1] %v1441_v55  ;;  %v1832_v56 = vpop.f32.mrb[19].mxu0 }
 0x6d4   :  { %v1514_v57 = vpop.f32.mrb[22].mxu1 }
 0x6d5   :  { %1519 = vst [vmem:[#allocation13 + $0x1] sm:$0x1] %v1514_v57  ;;  %v1839_v58 = vpop.f32.mrb[23].mxu1 }
 0x6d6   :  { %2075 = shalt.err (!%p2072_p10)
}
 0x6d7   :  { %s2076_s3 = scalar_lea.hbm %s2348_s9, 32 }
 0x6d8   :  { %p2077_p11 = scmp.ne.s32.totalorder %s2348_s9, %s2076_s3  ;;  %p2080_p12 = scmp.lt.u32.totalorder %s2076_s3, %s2348_s9 }
 0x6da   :  { %p2082_p13 = pnand %p2080_p12, %p2077_p11 }
 0x6dc   :  { %2085 = shalt.err (!%p2082_p13)
}
 0x6dd   :  { %s2111_s17 = smov 16   ;;  %s2112_s1 = smov 1  }
 0x6de   :  { %1531 = dma.vmem_to_hbm [thread:$0]  %s1526_s29, 32, %s2348_s9, [#allocation4], %s2111_s17, %s2111_s17, %s2112_s1  }
 0x6df   :  { %2094 = dma.done.wait [#allocation4], 32  }
 0x6e0   :  { %2095 = vsyncadd [#allocation4], 4294967264 }
 0x6e1   :  { %1535 = vsyncpa [#allocation3], 1 }
 0x6e2   :  { %1536 = vsyncpa [#allocation6], 1 }
 0x6e3   :  { %1537 = vsyncpa [#allocation9], 1 }
 0x6e4   :  { %1538 = vsyncpa [#allocation12], 1 }
 0x6e5   :  { %1539 = vsyncpa [#allocation4], 1 }

</bundles_post_ra>
